<compile_context>
chip_gen: v6e
topology: v6e:2x2x1
jax: 0.10.0
libtpu: 0.0.40
codegen_flags: <defaults>
</compile_context>

<pallas_src>
import jax
import jax.numpy as jnp
from jax.experimental import pallas as pl
from jax.experimental.pallas import tpu as pltpu

LN_EPS = 1e-5
BN_EPS = 1e-5

# Below this sequence length the score / weighted-sum passes are statically
# unrolled per timestep (no (TB, T, D) f32 temporaries); above it we fall back
# to the vectorized formulation to avoid trace blow-up.
_SMALL_T = 32


def _sv_kernel(x_ref, w_att_ref, b_att_ref, ln_g_ref, ln_b_ref,
               w1_ref, b1_ref, w2_ref, b2_ref, out_ref):
    TB, T, D = x_ref.shape
    w_att = w_att_ref[...]                       # (1, D) f32, VMEM-resident
    b_att = b_att_ref[0, 0]                      # scalar (SMEM)

    # ---- AttentionPooling: scores = Linear(D, 1)(x) -> (TB, T) ----
    if T <= _SMALL_T:
        # Per-timestep streaming: reads (TB, D) slices off the ref; never
        # materializes a (TB, T, D) f32 product in VMEM.
        cols = [jnp.sum(x_ref[:, t, :].astype(jnp.float32) * w_att,
                        axis=-1, keepdims=True) for t in range(T)]
        scores = jnp.concatenate(cols, axis=1) + b_att
    else:
        scores = jnp.sum(x_ref[...].astype(jnp.float32) * w_att, axis=-1) + b_att

    # softmax over the sequence axis (dim=1)
    m = jnp.max(scores, axis=1, keepdims=True)
    e = jnp.exp(scores - m)
    attn = e / jnp.sum(e, axis=1, keepdims=True)              # (TB, T)

    # weighted sum over T
    if T <= _SMALL_T:
        ws = jnp.zeros((TB, D), jnp.float32)
        for t in range(T):
            ws = ws + attn[:, t:t + 1] * x_ref[:, t, :].astype(jnp.float32)
    else:
        ws = jnp.sum(attn[:, :, None] * x_ref[...].astype(jnp.float32), axis=1)

    # LayerNorm over D (biased variance, like torch.nn.LayerNorm)
    mu = jnp.mean(ws, axis=-1, keepdims=True)
    var = jnp.mean((ws - mu) ** 2, axis=-1, keepdims=True)
    normed = (ws - mu) * jax.lax.rsqrt(var + LN_EPS)
    normed = normed * ln_g_ref[...] + ln_b_ref[...]            # (TB, D)

    # ---- fc1 (BatchNorm1d eval already folded into w1/b1) -> ReLU ----
    h = jnp.dot(normed, w1_ref[...], preferred_element_type=jnp.float32)
    h = jnp.maximum(h + b1_ref[...], 0.0)                      # (TB, Hp)
    # TODO(synk): Dropout(0.3) is identity in inference mode; no RNG masking.

    # ---- fc2 -> sigmoid (padded hidden lanes contribute exactly zero) ----
    logit = jnp.sum(h * w2_ref[...], axis=-1) + b2_ref[0, 0]   # (TB,)
    out_ref[0, 0, :] = jax.nn.sigmoid(logit).astype(out_ref.dtype)


def _vmem_limit_bytes():
    """Scoped-VMEM budget: 3/4 of physical VMEM, capped at 96 MiB.

    v5e/v6e (128 MiB physical) -> 96 MiB; v7x (64 MiB) -> 48 MiB.
    Falls back to a conservative 48 MiB if the query is unavailable.
    """
    try:
        cap = int(pltpu.get_tpu_info().vmem_capacity_bytes)
        return min((cap * 3) // 4, 96 * 1024 * 1024)
    except Exception:
        return 48 * 1024 * 1024


def _pick_batch_tile(B, T, D, vmem_limit):
    """Batch tile sizing with honest VMEM accounting.

    Per-step footprint ~= 2 x input block (double-buffered) + at most one
    block-sized temporary + small (TB, D)/(TB, Hp) accumulators + weights, so
    budgeting one block at vmem_limit/4 (counted at 4 B/elem regardless of the
    streamed dtype) keeps the total comfortably under vmem_limit on all of
    v5e / v6e / v7x.
    """
    budget = vmem_limit // 4
    row_bytes = T * D * 4
    tb = max(1, budget // row_bytes)
    # Cap at ~ceil(B/2) so the grid has >= 2 steps whenever possible and the
    # "parallel" batch axis can shard across both TensorCores on v7x.
    half = -(-B // 2)
    half = -(-half // 8) * 8
    tb = min(tb, max(8, half))
    if tb >= B:
        return B
    return max(1, (tb // 8) * 8)


def prepare_params(params, lane_pad=128):
    """One-time constant fold: BatchNorm1d(eval) into fc1; pad hidden to 128 lanes."""
    scale = params["bn_g"] * jax.lax.rsqrt(params["bn_v"] + BN_EPS)      # (1, H)
    w1 = params["w1"] * scale                                            # (D, H)
    b1 = (params["b1"] - params["bn_m"]) * scale + params["bn_b"]        # (1, H)
    w2 = params["w2"]                                                    # (1, H)

    H = w1.shape[1]
    Hp = ((H + lane_pad - 1) // lane_pad) * lane_pad
    if Hp != H:
        pad = Hp - H
        w1 = jnp.pad(w1, ((0, 0), (0, pad)))
        b1 = jnp.pad(b1, ((0, 0), (0, pad)))
        w2 = jnp.pad(w2, ((0, 0), (0, pad)))

    return {
        "w_att": params["w_att"].astype(jnp.float32),
        "b_att": params["b_att"].astype(jnp.float32),
        "ln_g": params["ln_g"].astype(jnp.float32),
        "ln_b": params["ln_b"].astype(jnp.float32),
        "w1": w1.astype(jnp.float32),
        "b1": b1.astype(jnp.float32),
        "w2": w2.astype(jnp.float32),
        "b2": params["b2"].astype(jnp.float32),
    }


def speaker_verification_forward(x, prepared):
    """x: (B, T, D) or (B, D); returns (B, 1) sigmoid scores.

    x is streamed in its native dtype (f32 or bf16) -- no wrapper-side cast.
    """
    if x.ndim == 2:
        x = x[:, None, :]                    # matches x.unsqueeze(1)
    B, T, D = x.shape
    Hp = prepared["w1"].shape[1]

    vmem_limit = _vmem_limit_bytes()
    TB = _pick_batch_tile(B, T, D, vmem_limit)
    G = pl.cdiv(B, TB)

    smem_scalar = pl.BlockSpec((1, 1), lambda i: (0, 0),
                               memory_space=pltpu.MemorySpace.SMEM)

    def const2d(shape):
        return pl.BlockSpec(shape, lambda i: (0, 0))

    in_specs = [
        pl.BlockSpec((TB, T, D), lambda i: (i, 0, 0)),   # x: batch-tiled stream
        const2d((1, D)),                                 # w_att
        smem_scalar,                                     # b_att (scalar)
        const2d((1, D)),                                 # ln_g
        const2d((1, D)),                                 # ln_b
        const2d((D, Hp)),                                # w1 (BN folded, padded)
        const2d((1, Hp)),                                # b1 (BN folded, padded)
        const2d((1, Hp)),                                # w2 (padded)
        smem_scalar,                                     # b2 (scalar)
    ]
    # Lane-dense output slab: (G, 1, TB) with TB on lanes -> unmasked stores.
    out_spec = pl.BlockSpec((1, 1, TB), lambda i: (i, 0, 0))

    weight_bytes = (3 * D + D * Hp + 2 * Hp + 2) * 4
    cost = pl.CostEstimate(
        flops=4 * B * T * D + 2 * B * D * Hp + 8 * B * D + 4 * B * Hp,
        transcendentals=B * T + 2 * B,
        bytes_accessed=x.size * x.dtype.itemsize + weight_bytes + B * 4,
    )

    out3d = pl.pallas_call(
        _sv_kernel,
        out_shape=jax.ShapeDtypeStruct((G, 1, TB), jnp.float32),
        grid=(G,),
        in_specs=in_specs,
        out_specs=out_spec,
        compiler_params=pltpu.CompilerParams(
            dimension_semantics=("parallel",),   # megacore sharding on v7x
            vmem_limit_bytes=vmem_limit,
        ),
        cost_estimate=cost,
    )(x, prepared["w_att"], prepared["b_att"], prepared["ln_g"],
      prepared["ln_b"], prepared["w1"], prepared["b1"],
      prepared["w2"], prepared["b2"])

    # Padded rows of a partial final batch tile may hold garbage (computed from
    # stale VMEM); they are sliced away here before anyone reads them.
    return out3d.reshape(G * TB)[:B].reshape(B, 1)


def init_params(key, input_size=192, hidden=64):
    ks = jax.random.split(key, 8)
    s_att = 1.0 / jnp.sqrt(input_size)
    s_fc1 = 1.0 / jnp.sqrt(input_size)
    s_fc2 = 1.0 / jnp.sqrt(hidden)
    return {
        # AttentionPooling
        "w_att": jax.random.uniform(ks[0], (1, input_size), jnp.float32, -s_att, s_att),
        "b_att": jax.random.uniform(ks[1], (1, 1), jnp.float32, -s_att, s_att),
        "ln_g": jnp.ones((1, input_size), jnp.float32),
        "ln_b": jnp.zeros((1, input_size), jnp.float32),
        # fc1 (stored transposed: (D, H))
        "w1": jax.random.uniform(ks[2], (input_size, hidden), jnp.float32, -s_fc1, s_fc1),
        "b1": jax.random.uniform(ks[3], (1, hidden), jnp.float32, -s_fc1, s_fc1),
        # BatchNorm1d(64) running stats + affine (fresh init)
        "bn_g": jnp.ones((1, hidden), jnp.float32),
        "bn_b": jnp.zeros((1, hidden), jnp.float32),
        "bn_m": jnp.zeros((1, hidden), jnp.float32),
        "bn_v": jnp.ones((1, hidden), jnp.float32),
        # fc2 (stored as (1, H) row vector)
        "w2": jax.random.uniform(ks[4], (1, hidden), jnp.float32, -s_fc2, s_fc2),
        "b2": jax.random.uniform(ks[5], (1, 1), jnp.float32, -s_fc2, s_fc2),
    }


def _reference_forward(x, params):
    """Pure-JAX f32 reference (same semantics as the PyTorch module in eval mode)."""
    if x.ndim == 2:
        x = x[:, None, :]
    x = x.astype(jnp.float32)
    scores = jnp.einsum("btd,hd->bth", x, params["w_att"]) + params["b_att"][0, 0]
    attn = jax.nn.softmax(scores, axis=1)
    ws = jnp.sum(attn * x, axis=1)
    mu = jnp.mean(ws, axis=-1, keepdims=True)
    var = jnp.mean((ws - mu) ** 2, axis=-1, keepdims=True)
    normed = (ws - mu) * jax.lax.rsqrt(var + LN_EPS)
    normed = normed * params["ln_g"] + params["ln_b"]
    h = normed @ params["w1"] + params["b1"]
    h = (h - params["bn_m"]) * jax.lax.rsqrt(params["bn_v"] + BN_EPS)
    h = h * params["bn_g"] + params["bn_b"]
    h = jnp.maximum(h, 0.0)
    logit = h @ params["w2"].T + params["b2"][0, 0]
    return jax.nn.sigmoid(logit)


if __name__ == "__main__":
    key = jax.random.PRNGKey(0)
    k_x, k_p = jax.random.split(key)

    B, T, D = 4, 8, 192          # ECAPA_TDNN_EMBEDDING_SIZE = 192
    x = jax.random.normal(k_x, (B, T, D), dtype=jnp.float32)
    params = init_params(k_p, input_size=D, hidden=64)
    prepared = prepare_params(params)

    out = speaker_verification_forward(x, prepared)
    out = jax.block_until_ready(out)
    assert out.shape == (B, 1)
    assert bool(jnp.all((out >= 0.0) & (out <= 1.0)))

    ref = _reference_forward(x, params)
    max_err = float(jnp.max(jnp.abs(out - ref)))
    assert bool(jnp.allclose(out, ref, atol=2e-3, rtol=2e-3)), f"max abs diff {max_err}"
    print("KERNEL_OK")
</pallas_src>

<mosaic_0001>
module attributes {stable_mosaic.version = 11 : i64} {
  func.func @_sv_kernel(%arg0: i32, %arg1: memref<4x8x192xf32, #tpu.memory_space<vmem>>, %arg2: memref<1x192xf32, #tpu.memory_space<vmem>>, %arg3: memref<1x1xf32, #tpu.memory_space<smem>>, %arg4: memref<1x192xf32, #tpu.memory_space<vmem>>, %arg5: memref<1x192xf32, #tpu.memory_space<vmem>>, %arg6: memref<192x128xf32, #tpu.memory_space<vmem>>, %arg7: memref<1x128xf32, #tpu.memory_space<vmem>>, %arg8: memref<1x128xf32, #tpu.memory_space<vmem>>, %arg9: memref<1x1xf32, #tpu.memory_space<smem>>, %arg10: memref<1x1x4xf32, #tpu.memory_space<vmem>>) attributes {dimension_semantics = [#tpu.dimension_semantics<parallel>], iteration_bounds = array<i64: 1>, scalar_prefetch = 0 : i64, scratch_operands = 0 : i64, tpu.core_type = #tpu.core_type<tc>, window_params = [{transform_indices = @transform_0, window_bounds = array<i64: 4, 8, 192>}, {pipeline_mode = #tpu.pipeline_mode<synchronous>, transform_indices = @transform_1, window_bounds = array<i64: 1, 192>}, {transform_indices = @transform_2, window_bounds = array<i64: 1, 1>}, {pipeline_mode = #tpu.pipeline_mode<synchronous>, transform_indices = @transform_3, window_bounds = array<i64: 1, 192>}, {pipeline_mode = #tpu.pipeline_mode<synchronous>, transform_indices = @transform_4, window_bounds = array<i64: 1, 192>}, {pipeline_mode = #tpu.pipeline_mode<synchronous>, transform_indices = @transform_5, window_bounds = array<i64: 192, 128>}, {pipeline_mode = #tpu.pipeline_mode<synchronous>, transform_indices = @transform_6, window_bounds = array<i64: 1, 128>}, {pipeline_mode = #tpu.pipeline_mode<synchronous>, transform_indices = @transform_7, window_bounds = array<i64: 1, 128>}, {transform_indices = @transform_8, window_bounds = array<i64: 1, 1>}, {transform_indices = @transform_9, window_bounds = array<i64: 1, 1, 4>}]} {
    %c0 = arith.constant 0 : index
    %c0_0 = arith.constant 0 : index
    %0 = vector.load %arg2[%c0, %c0_0] : memref<1x192xf32, #tpu.memory_space<vmem>>, vector<1x192xf32>
    %c0_1 = arith.constant 0 : index
    %c0_2 = arith.constant 0 : index
    %1 = memref.load %arg3[%c0_1, %c0_2] : memref<1x1xf32, #tpu.memory_space<smem>>
    %c0_3 = arith.constant 0 : index
    %c0_4 = arith.constant 0 : index
    %c0_5 = arith.constant 0 : index
    %2 = vector.load %arg1[%c0_3, %c0_4, %c0_5] : memref<4x8x192xf32, #tpu.memory_space<vmem>>, vector<4x1x192xf32>
    %3 = vector.shape_cast %2 : vector<4x1x192xf32> to vector<4x192xf32>
    %4 = vector.broadcast %0 : vector<1x192xf32> to vector<4x192xf32>
    %5 = arith.mulf %3, %4 : vector<4x192xf32>
    %cst = arith.constant dense<0.000000e+00> : vector<4xf32>
    %6 = vector.multi_reduction <add>, %5, %cst [1] : vector<4x192xf32> to vector<4xf32>
    %7 = vector.shape_cast %6 : vector<4xf32> to vector<4x1xf32>
    %c0_6 = arith.constant 0 : index
    %c1 = arith.constant 1 : index
    %c0_7 = arith.constant 0 : index
    %8 = vector.load %arg1[%c0_6, %c1, %c0_7] : memref<4x8x192xf32, #tpu.memory_space<vmem>>, vector<4x1x192xf32>
    %9 = vector.shape_cast %8 : vector<4x1x192xf32> to vector<4x192xf32>
    %10 = vector.broadcast %0 : vector<1x192xf32> to vector<4x192xf32>
    %11 = arith.mulf %9, %10 : vector<4x192xf32>
    %cst_8 = arith.constant dense<0.000000e+00> : vector<4xf32>
    %12 = vector.multi_reduction <add>, %11, %cst_8 [1] : vector<4x192xf32> to vector<4xf32>
    %13 = vector.shape_cast %12 : vector<4xf32> to vector<4x1xf32>
    %c0_9 = arith.constant 0 : index
    %c2 = arith.constant 2 : index
    %c0_10 = arith.constant 0 : index
    %14 = vector.load %arg1[%c0_9, %c2, %c0_10] : memref<4x8x192xf32, #tpu.memory_space<vmem>>, vector<4x1x192xf32>
    %15 = vector.shape_cast %14 : vector<4x1x192xf32> to vector<4x192xf32>
    %16 = vector.broadcast %0 : vector<1x192xf32> to vector<4x192xf32>
    %17 = arith.mulf %15, %16 : vector<4x192xf32>
    %cst_11 = arith.constant dense<0.000000e+00> : vector<4xf32>
    %18 = vector.multi_reduction <add>, %17, %cst_11 [1] : vector<4x192xf32> to vector<4xf32>
    %19 = vector.shape_cast %18 : vector<4xf32> to vector<4x1xf32>
    %c0_12 = arith.constant 0 : index
    %c3 = arith.constant 3 : index
    %c0_13 = arith.constant 0 : index
    %20 = vector.load %arg1[%c0_12, %c3, %c0_13] : memref<4x8x192xf32, #tpu.memory_space<vmem>>, vector<4x1x192xf32>
    %21 = vector.shape_cast %20 : vector<4x1x192xf32> to vector<4x192xf32>
    %22 = vector.broadcast %0 : vector<1x192xf32> to vector<4x192xf32>
    %23 = arith.mulf %21, %22 : vector<4x192xf32>
    %cst_14 = arith.constant dense<0.000000e+00> : vector<4xf32>
    %24 = vector.multi_reduction <add>, %23, %cst_14 [1] : vector<4x192xf32> to vector<4xf32>
    %25 = vector.shape_cast %24 : vector<4xf32> to vector<4x1xf32>
    %c0_15 = arith.constant 0 : index
    %c4 = arith.constant 4 : index
    %c0_16 = arith.constant 0 : index
    %26 = vector.load %arg1[%c0_15, %c4, %c0_16] : memref<4x8x192xf32, #tpu.memory_space<vmem>>, vector<4x1x192xf32>
    %27 = vector.shape_cast %26 : vector<4x1x192xf32> to vector<4x192xf32>
    %28 = vector.broadcast %0 : vector<1x192xf32> to vector<4x192xf32>
    %29 = arith.mulf %27, %28 : vector<4x192xf32>
    %cst_17 = arith.constant dense<0.000000e+00> : vector<4xf32>
    %30 = vector.multi_reduction <add>, %29, %cst_17 [1] : vector<4x192xf32> to vector<4xf32>
    %31 = vector.shape_cast %30 : vector<4xf32> to vector<4x1xf32>
    %c0_18 = arith.constant 0 : index
    %c5 = arith.constant 5 : index
    %c0_19 = arith.constant 0 : index
    %32 = vector.load %arg1[%c0_18, %c5, %c0_19] : memref<4x8x192xf32, #tpu.memory_space<vmem>>, vector<4x1x192xf32>
    %33 = vector.shape_cast %32 : vector<4x1x192xf32> to vector<4x192xf32>
    %34 = vector.broadcast %0 : vector<1x192xf32> to vector<4x192xf32>
    %35 = arith.mulf %33, %34 : vector<4x192xf32>
    %cst_20 = arith.constant dense<0.000000e+00> : vector<4xf32>
    %36 = vector.multi_reduction <add>, %35, %cst_20 [1] : vector<4x192xf32> to vector<4xf32>
    %37 = vector.shape_cast %36 : vector<4xf32> to vector<4x1xf32>
    %c0_21 = arith.constant 0 : index
    %c6 = arith.constant 6 : index
    %c0_22 = arith.constant 0 : index
    %38 = vector.load %arg1[%c0_21, %c6, %c0_22] : memref<4x8x192xf32, #tpu.memory_space<vmem>>, vector<4x1x192xf32>
    %39 = vector.shape_cast %38 : vector<4x1x192xf32> to vector<4x192xf32>
    %40 = vector.broadcast %0 : vector<1x192xf32> to vector<4x192xf32>
    %41 = arith.mulf %39, %40 : vector<4x192xf32>
    %cst_23 = arith.constant dense<0.000000e+00> : vector<4xf32>
    %42 = vector.multi_reduction <add>, %41, %cst_23 [1] : vector<4x192xf32> to vector<4xf32>
    %43 = vector.shape_cast %42 : vector<4xf32> to vector<4x1xf32>
    %c0_24 = arith.constant 0 : index
    %c7 = arith.constant 7 : index
    %c0_25 = arith.constant 0 : index
    %44 = vector.load %arg1[%c0_24, %c7, %c0_25] : memref<4x8x192xf32, #tpu.memory_space<vmem>>, vector<4x1x192xf32>
    %45 = vector.shape_cast %44 : vector<4x1x192xf32> to vector<4x192xf32>
    %46 = vector.broadcast %0 : vector<1x192xf32> to vector<4x192xf32>
    %47 = arith.mulf %45, %46 : vector<4x192xf32>
    %cst_26 = arith.constant dense<0.000000e+00> : vector<4xf32>
    %48 = vector.multi_reduction <add>, %47, %cst_26 [1] : vector<4x192xf32> to vector<4xf32>
    %49 = vector.shape_cast %48 : vector<4xf32> to vector<4x1xf32>
    %50 = tpu.concatenate %7, %13, %19, %25, %31, %37, %43, %49 in 1 : vector<4x1xf32>, vector<4x1xf32>, vector<4x1xf32>, vector<4x1xf32>, vector<4x1xf32>, vector<4x1xf32>, vector<4x1xf32>, vector<4x1xf32> -> vector<4x8xf32>
    %51 = vector.broadcast %1 : f32 to vector<4x8xf32>
    %52 = arith.addf %50, %51 : vector<4x8xf32>
    %cst_27 = arith.constant dense<0xFF800000> : vector<4xf32>
    %53 = vector.multi_reduction <maximumf>, %52, %cst_27 [1] : vector<4x8xf32> to vector<4xf32>
    %54 = vector.shape_cast %53 : vector<4xf32> to vector<4x1xf32>
    %55 = vector.broadcast %54 : vector<4x1xf32> to vector<4x8xf32>
    %56 = arith.subf %52, %55 : vector<4x8xf32>
    %57 = math.exp %56 : vector<4x8xf32>
    %cst_28 = arith.constant dense<0.000000e+00> : vector<4xf32>
    %58 = vector.multi_reduction <add>, %57, %cst_28 [1] : vector<4x8xf32> to vector<4xf32>
    %59 = vector.shape_cast %58 : vector<4xf32> to vector<4x1xf32>
    %60 = vector.broadcast %59 : vector<4x1xf32> to vector<4x8xf32>
    %61 = arith.divf %57, %60 : vector<4x8xf32>
    %cst_29 = arith.constant 0.000000e+00 : f32
    %62 = vector.broadcast %cst_29 : f32 to vector<4x192xf32>
    %63 = vector.extract_strided_slice %61 {offsets = [0, 0], sizes = [4, 1], strides = [1, 1]} : vector<4x8xf32> to vector<4x1xf32>
    %c0_30 = arith.constant 0 : index
    %c0_31 = arith.constant 0 : index
    %c0_32 = arith.constant 0 : index
    %64 = vector.load %arg1[%c0_30, %c0_31, %c0_32] : memref<4x8x192xf32, #tpu.memory_space<vmem>>, vector<4x1x192xf32>
    %65 = vector.shape_cast %64 : vector<4x1x192xf32> to vector<4x192xf32>
    %66 = vector.broadcast %63 : vector<4x1xf32> to vector<4x192xf32>
    %67 = arith.mulf %66, %65 : vector<4x192xf32>
    %68 = arith.addf %62, %67 : vector<4x192xf32>
    %69 = vector.extract_strided_slice %61 {offsets = [0, 1], sizes = [4, 1], strides = [1, 1]} : vector<4x8xf32> to vector<4x1xf32>
    %c0_33 = arith.constant 0 : index
    %c1_34 = arith.constant 1 : index
    %c0_35 = arith.constant 0 : index
    %70 = vector.load %arg1[%c0_33, %c1_34, %c0_35] : memref<4x8x192xf32, #tpu.memory_space<vmem>>, vector<4x1x192xf32>
    %71 = vector.shape_cast %70 : vector<4x1x192xf32> to vector<4x192xf32>
    %72 = vector.broadcast %69 : vector<4x1xf32> to vector<4x192xf32>
    %73 = arith.mulf %72, %71 : vector<4x192xf32>
    %74 = arith.addf %68, %73 : vector<4x192xf32>
    %75 = vector.extract_strided_slice %61 {offsets = [0, 2], sizes = [4, 1], strides = [1, 1]} : vector<4x8xf32> to vector<4x1xf32>
    %c0_36 = arith.constant 0 : index
    %c2_37 = arith.constant 2 : index
    %c0_38 = arith.constant 0 : index
    %76 = vector.load %arg1[%c0_36, %c2_37, %c0_38] : memref<4x8x192xf32, #tpu.memory_space<vmem>>, vector<4x1x192xf32>
    %77 = vector.shape_cast %76 : vector<4x1x192xf32> to vector<4x192xf32>
    %78 = vector.broadcast %75 : vector<4x1xf32> to vector<4x192xf32>
    %79 = arith.mulf %78, %77 : vector<4x192xf32>
    %80 = arith.addf %74, %79 : vector<4x192xf32>
    %81 = vector.extract_strided_slice %61 {offsets = [0, 3], sizes = [4, 1], strides = [1, 1]} : vector<4x8xf32> to vector<4x1xf32>
    %c0_39 = arith.constant 0 : index
    %c3_40 = arith.constant 3 : index
    %c0_41 = arith.constant 0 : index
    %82 = vector.load %arg1[%c0_39, %c3_40, %c0_41] : memref<4x8x192xf32, #tpu.memory_space<vmem>>, vector<4x1x192xf32>
    %83 = vector.shape_cast %82 : vector<4x1x192xf32> to vector<4x192xf32>
    %84 = vector.broadcast %81 : vector<4x1xf32> to vector<4x192xf32>
    %85 = arith.mulf %84, %83 : vector<4x192xf32>
    %86 = arith.addf %80, %85 : vector<4x192xf32>
    %87 = vector.extract_strided_slice %61 {offsets = [0, 4], sizes = [4, 1], strides = [1, 1]} : vector<4x8xf32> to vector<4x1xf32>
    %c0_42 = arith.constant 0 : index
    %c4_43 = arith.constant 4 : index
    %c0_44 = arith.constant 0 : index
    %88 = vector.load %arg1[%c0_42, %c4_43, %c0_44] : memref<4x8x192xf32, #tpu.memory_space<vmem>>, vector<4x1x192xf32>
    %89 = vector.shape_cast %88 : vector<4x1x192xf32> to vector<4x192xf32>
    %90 = vector.broadcast %87 : vector<4x1xf32> to vector<4x192xf32>
    %91 = arith.mulf %90, %89 : vector<4x192xf32>
    %92 = arith.addf %86, %91 : vector<4x192xf32>
    %93 = vector.extract_strided_slice %61 {offsets = [0, 5], sizes = [4, 1], strides = [1, 1]} : vector<4x8xf32> to vector<4x1xf32>
    %c0_45 = arith.constant 0 : index
    %c5_46 = arith.constant 5 : index
    %c0_47 = arith.constant 0 : index
    %94 = vector.load %arg1[%c0_45, %c5_46, %c0_47] : memref<4x8x192xf32, #tpu.memory_space<vmem>>, vector<4x1x192xf32>
    %95 = vector.shape_cast %94 : vector<4x1x192xf32> to vector<4x192xf32>
    %96 = vector.broadcast %93 : vector<4x1xf32> to vector<4x192xf32>
    %97 = arith.mulf %96, %95 : vector<4x192xf32>
    %98 = arith.addf %92, %97 : vector<4x192xf32>
    %99 = vector.extract_strided_slice %61 {offsets = [0, 6], sizes = [4, 1], strides = [1, 1]} : vector<4x8xf32> to vector<4x1xf32>
    %c0_48 = arith.constant 0 : index
    %c6_49 = arith.constant 6 : index
    %c0_50 = arith.constant 0 : index
    %100 = vector.load %arg1[%c0_48, %c6_49, %c0_50] : memref<4x8x192xf32, #tpu.memory_space<vmem>>, vector<4x1x192xf32>
    %101 = vector.shape_cast %100 : vector<4x1x192xf32> to vector<4x192xf32>
    %102 = vector.broadcast %99 : vector<4x1xf32> to vector<4x192xf32>
    %103 = arith.mulf %102, %101 : vector<4x192xf32>
    %104 = arith.addf %98, %103 : vector<4x192xf32>
    %105 = vector.extract_strided_slice %61 {offsets = [0, 7], sizes = [4, 1], strides = [1, 1]} : vector<4x8xf32> to vector<4x1xf32>
    %c0_51 = arith.constant 0 : index
    %c7_52 = arith.constant 7 : index
    %c0_53 = arith.constant 0 : index
    %106 = vector.load %arg1[%c0_51, %c7_52, %c0_53] : memref<4x8x192xf32, #tpu.memory_space<vmem>>, vector<4x1x192xf32>
    %107 = vector.shape_cast %106 : vector<4x1x192xf32> to vector<4x192xf32>
    %108 = vector.broadcast %105 : vector<4x1xf32> to vector<4x192xf32>
    %109 = arith.mulf %108, %107 : vector<4x192xf32>
    %110 = arith.addf %104, %109 : vector<4x192xf32>
    %cst_54 = arith.constant dense<0.000000e+00> : vector<4xf32>
    %111 = vector.multi_reduction <add>, %110, %cst_54 [1] : vector<4x192xf32> to vector<4xf32>
    %112 = vector.shape_cast %111 : vector<4xf32> to vector<4x1xf32>
    %cst_55 = arith.constant 1.920000e+02 : f32
    %113 = vector.broadcast %cst_55 : f32 to vector<4x1xf32>
    %114 = arith.divf %112, %113 : vector<4x1xf32>
    %115 = vector.broadcast %114 : vector<4x1xf32> to vector<4x192xf32>
    %116 = arith.subf %110, %115 : vector<4x192xf32>
    %117 = arith.mulf %116, %116 : vector<4x192xf32>
    %cst_56 = arith.constant dense<0.000000e+00> : vector<4xf32>
    %118 = vector.multi_reduction <add>, %117, %cst_56 [1] : vector<4x192xf32> to vector<4xf32>
    %119 = vector.shape_cast %118 : vector<4xf32> to vector<4x1xf32>
    %cst_57 = arith.constant 1.920000e+02 : f32
    %120 = vector.broadcast %cst_57 : f32 to vector<4x1xf32>
    %121 = arith.divf %119, %120 : vector<4x1xf32>
    %122 = vector.broadcast %114 : vector<4x1xf32> to vector<4x192xf32>
    %123 = arith.subf %110, %122 : vector<4x192xf32>
    %cst_58 = arith.constant 9.99999974E-6 : f32
    %124 = vector.broadcast %cst_58 : f32 to vector<4x1xf32>
    %125 = arith.addf %121, %124 : vector<4x1xf32>
    %126 = math.rsqrt %125 : vector<4x1xf32>
    %127 = vector.broadcast %126 : vector<4x1xf32> to vector<4x192xf32>
    %128 = arith.mulf %123, %127 : vector<4x192xf32>
    %c0_59 = arith.constant 0 : index
    %c0_60 = arith.constant 0 : index
    %129 = vector.load %arg4[%c0_59, %c0_60] : memref<1x192xf32, #tpu.memory_space<vmem>>, vector<1x192xf32>
    %130 = vector.broadcast %129 : vector<1x192xf32> to vector<4x192xf32>
    %131 = arith.mulf %128, %130 : vector<4x192xf32>
    %c0_61 = arith.constant 0 : index
    %c0_62 = arith.constant 0 : index
    %132 = vector.load %arg5[%c0_61, %c0_62] : memref<1x192xf32, #tpu.memory_space<vmem>>, vector<1x192xf32>
    %133 = vector.broadcast %132 : vector<1x192xf32> to vector<4x192xf32>
    %134 = arith.addf %131, %133 : vector<4x192xf32>
    %c0_63 = arith.constant 0 : index
    %c0_64 = arith.constant 0 : index
    %135 = vector.load %arg6[%c0_63, %c0_64] : memref<192x128xf32, #tpu.memory_space<vmem>>, vector<192x128xf32>
    %cst_65 = arith.constant dense<0.000000e+00> : vector<4x128xf32>
    %136 = tpu.matmul %134, %135, %cst_65 {dimension_numbers = #tpu.dot_dimension_numbers<[1], [0], [0], [1], [0, 0, 1, 1], [], []>} : vector<4x192xf32>, vector<192x128xf32>, vector<4x128xf32> -> vector<4x128xf32>
    %c0_66 = arith.constant 0 : index
    %c0_67 = arith.constant 0 : index
    %137 = vector.load %arg7[%c0_66, %c0_67] : memref<1x128xf32, #tpu.memory_space<vmem>>, vector<1x128xf32>
    %138 = vector.broadcast %137 : vector<1x128xf32> to vector<4x128xf32>
    %139 = arith.addf %136, %138 : vector<4x128xf32>
    %cst_68 = arith.constant 0.000000e+00 : f32
    %140 = vector.broadcast %cst_68 : f32 to vector<4x128xf32>
    %141 = arith.maximumf %139, %140 : vector<4x128xf32>
    %c0_69 = arith.constant 0 : index
    %c0_70 = arith.constant 0 : index
    %142 = vector.load %arg8[%c0_69, %c0_70] : memref<1x128xf32, #tpu.memory_space<vmem>>, vector<1x128xf32>
    %143 = vector.broadcast %142 : vector<1x128xf32> to vector<4x128xf32>
    %144 = arith.mulf %141, %143 : vector<4x128xf32>
    %cst_71 = arith.constant dense<0.000000e+00> : vector<4xf32>
    %145 = vector.multi_reduction <add>, %144, %cst_71 [1] : vector<4x128xf32> to vector<4xf32>
    %c0_72 = arith.constant 0 : index
    %c0_73 = arith.constant 0 : index
    %146 = memref.load %arg9[%c0_72, %c0_73] : memref<1x1xf32, #tpu.memory_space<smem>>
    %147 = vector.broadcast %146 : f32 to vector<4xf32>
    %148 = arith.addf %145, %147 : vector<4xf32>
    %149 = arith.negf %148 : vector<4xf32>
    %150 = math.exp %149 : vector<4xf32>
    %cst_74 = arith.constant 1.000000e+00 : f32
    %151 = vector.broadcast %cst_74 : f32 to vector<4xf32>
    %152 = arith.addf %151, %150 : vector<4xf32>
    %153 = arith.divf %151, %152 : vector<4xf32>
    %c0_75 = arith.constant 0 : index
    %c0_76 = arith.constant 0 : index
    %c0_77 = arith.constant 0 : index
    %154 = vector.load %arg10[%c0_75, %c0_76, %c0_77] : memref<1x1x4xf32, #tpu.memory_space<vmem>>, vector<1x1x4xf32>
    %155 = vector.shape_cast %154 : vector<1x1x4xf32> to vector<4xf32>
    %156 = vector.shape_cast %153 : vector<4xf32> to vector<1x1x4xf32>
    tpu.vector_store %arg10[%c0_75, %c0_76, %c0_77], %156 {strides = array<i32>} : memref<1x1x4xf32, #tpu.memory_space<vmem>>, vector<1x1x4xf32>,
    return
  }
  func.func @transform_0(%arg0: i32) -> (i32, i32, i32) {
    %c0_i32 = arith.constant 0 : i32
    %c0_i32_0 = arith.constant 0 : i32
    %c0_i32_1 = arith.constant 0 : i32
    return %arg0, %c0_i32, %c0_i32_0 : i32, i32, i32
  }
  func.func @transform_1(%arg0: i32) -> (i32, i32) {
    %c0_i32 = arith.constant 0 : i32
    %c0_i32_0 = arith.constant 0 : i32
    %c0_i32_1 = arith.constant 0 : i32
    return %c0_i32, %c0_i32_0 : i32, i32
  }
  func.func @transform_2(%arg0: i32) -> (i32, i32) {
    %c0_i32 = arith.constant 0 : i32
    %c0_i32_0 = arith.constant 0 : i32
    %c0_i32_1 = arith.constant 0 : i32
    return %c0_i32, %c0_i32_0 : i32, i32
  }
  func.func @transform_3(%arg0: i32) -> (i32, i32) {
    %c0_i32 = arith.constant 0 : i32
    %c0_i32_0 = arith.constant 0 : i32
    %c0_i32_1 = arith.constant 0 : i32
    return %c0_i32, %c0_i32_0 : i32, i32
  }
  func.func @transform_4(%arg0: i32) -> (i32, i32) {
    %c0_i32 = arith.constant 0 : i32
    %c0_i32_0 = arith.constant 0 : i32
    %c0_i32_1 = arith.constant 0 : i32
    return %c0_i32, %c0_i32_0 : i32, i32
  }
  func.func @transform_5(%arg0: i32) -> (i32, i32) {
    %c0_i32 = arith.constant 0 : i32
    %c0_i32_0 = arith.constant 0 : i32
    %c0_i32_1 = arith.constant 0 : i32
    return %c0_i32, %c0_i32_0 : i32, i32
  }
  func.func @transform_6(%arg0: i32) -> (i32, i32) {
    %c0_i32 = arith.constant 0 : i32
    %c0_i32_0 = arith.constant 0 : i32
    %c0_i32_1 = arith.constant 0 : i32
    return %c0_i32, %c0_i32_0 : i32, i32
  }
  func.func @transform_7(%arg0: i32) -> (i32, i32) {
    %c0_i32 = arith.constant 0 : i32
    %c0_i32_0 = arith.constant 0 : i32
    %c0_i32_1 = arith.constant 0 : i32
    return %c0_i32, %c0_i32_0 : i32, i32
  }
  func.func @transform_8(%arg0: i32) -> (i32, i32) {
    %c0_i32 = arith.constant 0 : i32
    %c0_i32_0 = arith.constant 0 : i32
    %c0_i32_1 = arith.constant 0 : i32
    return %c0_i32, %c0_i32_0 : i32, i32
  }
  func.func @transform_9(%arg0: i32) -> (i32, i32, i32) {
    %c0_i32 = arith.constant 0 : i32
    %c0_i32_0 = arith.constant 0 : i32
    %c0_i32_1 = arith.constant 0 : i32
    return %arg0, %c0_i32, %c0_i32_0 : i32, i32, i32
  }
}

</mosaic_0001>

<bundles_post_ra>
// kernel: tpu_custom_call.1
= control target key start
LH: loop header
LB: loop body
LE: loop exit
PB: predicated region body
PF: predicated region fallthrough
CT: control target
= control target key end

     0   :  { %16 = vsyncpa [#allocation5], 0  ;;  %s1652_s0 = inlined_call_operand.hbm [shape: f32[4,8,192], index: 0, kind: input, shape index: {}]   ;;  %s1653_s1 = inlined_call_operand.vmem [shape: f32[1,192], index: 1, kind: input, shape index: {}]   ;;  %s1654_s2 = inlined_call_operand.<no memory space> [shape: f32[1,1], index: 2, kind: input, shape index: {}]   ;;  %s1655_s3 = inlined_call_operand.vmem [shape: f32[1,192], index: 3, kind: input, shape index: {}]   ;;  %s1656_s4 = inlined_call_operand.vmem [shape: f32[1,192], index: 4, kind: input, shape index: {}]   ;;  %s1657_s5 = inlined_call_operand.hbm [shape: f32[192,128], index: 5, kind: input, shape index: {}]   ;;  %s1658_s6 = inlined_call_operand.vmem [shape: f32[1,128], index: 6, kind: input, shape index: {}]   ;;  %s1659_s7 = inlined_call_operand.vmem [shape: f32[1,128], index: 7, kind: input, shape index: {}]   ;;  %s1660_s8 = inlined_call_operand.<no memory space> [shape: f32[1,1], index: 8, kind: input, shape index: {}]   ;;  %s1661_s9 = inlined_call_operand.hbm [shape: f32[1,1,4], index: 9, kind: output, shape index: {}]  }
   0x1   :  { %17 = vsyncpa [#allocation8], 0 }
   0x2   :  { %18 = vsyncpa [#allocation6], 0  ;;  %s1248_s30 = smov [#allocation4]  }
   0x3   :  { %s24_s10 = sshll.u32 %s1248_s30, 4  ;;  %s25_s10 = int_to_ptr.vmem [resolvable:$true] %s24_s10 }
   0x4   :  { %s1190_s11 = scalar_lea.vmem %s25_s10, 1024  ;;  %p1195_p1 = scmp.lt.s32.totalorder %s25_s10, %s25_s10 }
   0x5   :  { %p1191_p0 = scmp.ne.s32.totalorder %s25_s10, %s1190_s11  ;;  %p1196_p2 = scmp.lt.s32.totalorder %s1190_s11, %s1190_s11 }
   0x7   :  { %p1197_p3 = por %p1196_p2, %p1195_p1 }
   0x9   :  { %p1198_p4 = pnand %p1197_p3, %p1191_p0 }
   0xb   :  { %1201 = shalt.err (!%p1198_p4)
}
   0xc   :  { %s1249_s12 = smov 256   ;;  %s1250_s13 = smov 16  }
   0xd   :  { %30 = dma.hbm_to_vmem [thread:$0]  %s1652_s0, 1024, %s25_s10, [#allocation5], %s1249_s12, %s1249_s12, %s1250_s13  }
   0xe   :  { %s1251_s16 = smov [#allocation7]  }
   0xf   :  { %s44_s17 = sshll.u32 %s1251_s16, 4  ;;  %s45_s17 = int_to_ptr.vmem [resolvable:$true] %s44_s17 }
  0x10   :  { %s1210_s18 = scalar_lea.vmem %s45_s17, 3072  ;;  %p1215_p6 = scmp.lt.s32.totalorder %s45_s17, %s45_s17 }
  0x11   :  { %p1211_p5 = scmp.ne.s32.totalorder %s45_s17, %s1210_s18  ;;  %p1216_p7 = scmp.lt.s32.totalorder %s1210_s18, %s1210_s18 }
  0x13   :  { %p1217_p8 = por %p1216_p7, %p1215_p6 }
  0x15   :  { %p1218_p9 = pnand %p1217_p8, %p1211_p5 }
  0x17   :  { %1221 = shalt.err (!%p1218_p9)
}
  0x18   :  { %s1252_s19 = smov 128   ;;  %s1253_s20 = smov 8  }
  0x19   :  { %50 = dma.hbm_to_vmem [thread:$0]  %s1657_s5, 3072, %s45_s17, [#allocation8], %s1252_s19, %s1252_s19, %s1253_s20  }
  0x1a   :  { %1242 = dma.done.wait [#allocation5], 1024  }
  0x1b   :  { %1243 = vsyncadd [#allocation5], 4294966272 }
  0x1c   :  { %1244 = dma.done.wait [#allocation8], 3072  }
  0x1d   :  { %1245 = vsyncadd [#allocation8], 4294964224  ;;  %v73_v0 = vlaneseq  ;;  %v1254_v1 = vmov 1966171168   ;;  %v63_v7 = vld [vmem:[%s1653_s1] sm:$0x3] }
  0x1e   :  { %v83_v2 = vunpack.c.l.s4 %v1254_v1  ;;  %v1338_v12 = vld [vmem:[#allocation4] ss:$8 sm:$0x3]  ;;  %v1341_v14 = vld [vmem:[#allocation4 + $0x10] ss:$8 sm:$0x3] }
  0x1f   :  { %v1322_v3 = vshrl.u32 %v73_v0, 7  ;;  %v1343_v15 = vld [vmem:[#allocation4 + $0x20] ss:$8 sm:$0x3]  ;;  %vm152_vm0 = vcmask 1043456   ;;  %vm154_vm1 = vcmask 519168  }
  0x20   :  { %v84_v6 = vunpack.c.0.s8 %v83_v2  ;;  %v1345_v16 = vld [vmem:[#allocation4 + $0x2] ss:$8 sm:$0x3]  ;;  %v1347_v17 = vld [vmem:[#allocation4 + $0x12] ss:$8 sm:$0x3] }
  0x21   :  { %v1325_v4 = vsub.s32 0, %v1322_v3  ;;  %v1328_v5 = vsub.s32 1, %v1322_v3  ;;  %v1352_v20 = vld [vmem:[#allocation4 + $0x22] ss:$8 sm:$0x3]  ;;  %vm544_vm2 = vcmask 7168  }
  0x22   :  { %v1336_v10 = vsub.s32 %v84_v6, %v1322_v3  ;;  %v1354_v21 = vld [vmem:[#allocation4 + $0x1] ss:$8 sm:$0x3]  ;;  %v1356_v22 = vld [vmem:[#allocation4 + $0x3] ss:$8 sm:$0x3] }
  0x23   :  { %v76_v8 = vrot.slane %v63_v7, %v1325_v4  ;;  %v80_v9 = vrot.slane %v63_v7, %v1328_v5  ;;  %v1358_v23 = vld [vmem:[#allocation4 + $0x30] ss:$8 sm:$0x3]  ;;  %v1360_v24 = vld [vmem:[#allocation4 + $0x11] ss:$8 sm:$0x3] }
  0x24   :  { %v1362_v25 = vld [vmem:[#allocation4 + $0x4] ss:$8 sm:$0x3]  ;;  %v1375_v30 = vld [vmem:[#allocation4 + $0x21] ss:$8 sm:$0x3] }
  0x25   :  { %v81_v11 = vcombine.low %v76_v8, %v80_v9  ;;  %v1377_v31 = vld [vmem:[#allocation4 + $0x13] ss:$8 sm:$0x3]  ;;  %v1379_v32 = vld [vmem:[#allocation4 + $0x32] ss:$8 sm:$0x3] }
  0x26   :  { %v1381_v33 = vld [vmem:[#allocation4 + $0x31] ss:$8 sm:$0x3]  ;;  %v1401_v41 = vld [vmem:[#allocation4 + $0x23] ss:$8 sm:$0x3] }
  0x27   :  { %v88_v13 = vrot.slane %v81_v11, %v1336_v10  ;;  %v1403_v42 = vld [vmem:[#allocation4 + $0x33] ss:$8 sm:$0x3]  ;;  %v1423_v55 = vld [vmem:[#allocation4 + $0x14] ss:$8 sm:$0x3] }
  0x28   :  { %v1425_v56 = vld [vmem:[#allocation4 + $0x24] ss:$8 sm:$0x3]  ;;  %v1429_v61 = vld [vmem:[#allocation4 + $0x34] ss:$8 sm:$0x3] }
  0x29   :  { %v89_v18 = vcombine.high %v88_v13, %v88_v13  ;;  %v1350_v19 = vrot.slane %v88_v13, %v1336_v10  ;;  %vm546_vm3 = vcmask 15360   ;;  %vm548_vm4 = vcmask 23552  }
  0x2a   :  { %vm550_vm5 = vcmask 31744   ;;  %vm552_vm6 = vcmask 39936   ;;  %vm554_vm7 = vcmask 48128   ;;  %vm556_vm8 = vcmask 56320  }
  0x2b   :  { %v1365_v26 = vrot.slane %v89_v18, %v1336_v10  ;;  %v1369_v27 = vcombine.high %v1350_v19, %v1350_v19  ;;  %v110_v28 = vmul.f32 %v1350_v19, %v1338_v12  ;;  %v222_v29 = vmul.f32 %v1345_v16, %v1350_v19 }
  0x2c   :  { %v167_v34 = vmul.f32 %v1354_v21, %v1350_v19  ;;  %v277_v35 = vmul.f32 %v1356_v22, %v1350_v19  ;;  %v1389_v36 = vmul.f32 %v1362_v25, %v1350_v19  ;;  %vm560_vm9 = vcmask 60416  }
  0x2d   :  { %v1393_v37 = vcombine.high %v1365_v26, %v1365_v26  ;;  %v111_v38 = vmul.f32 %v1365_v26, %v1341_v14  ;;  %v112_v39 = vmul.f32 %v1369_v27, %v1343_v15  ;;  %v223_v40 = vmul.f32 %v1347_v17, %v1365_v26 }
  0x2e   :  { %v224_v43 = vmul.f32 %v1352_v20, %v1369_v27  ;;  %v168_v44 = vmul.f32 %v1360_v24, %v1365_v26  ;;  %v169_v45 = vmul.f32 %v1375_v30, %v1369_v27  ;;  %v278_v46 = vmul.f32 %v1377_v31, %v1365_v26 }
  0x2f   :  { %v113_v47 = vmul.f32 %v1393_v37, %v1358_v23  ;;  %v118_v48 = vcombine.low %v110_v28, %v111_v38  ;;  %v225_v49 = vmul.f32 %v1379_v32, %v1393_v37  ;;  %v230_v50 = vcombine.low %v222_v29, %v223_v40 }
  0x30   :  { %v170_v51 = vmul.f32 %v1381_v33, %v1393_v37  ;;  %v175_v52 = vcombine.low %v167_v34, %v168_v44  ;;  %v279_v53 = vmul.f32 %v1401_v41, %v1369_v27  ;;  %v280_v54 = vmul.f32 %v1403_v42, %v1393_v37 }
  0x31   :  { %v119_v57 = vcombine.low %v112_v39, %v113_v47  ;;  %v126_v58 = vrot.slane %v118_v48, %v1336_v10  ;;  %v231_v59 = vcombine.low %v224_v43, %v225_v49  ;;  %v238_v60 = vrot.slane %v230_v50, %v1336_v10  ;;  %v1447_v49 = vld [vmem:[#allocation4 + $0x5] ss:$8 sm:$0x3] }
  0x32   :  { %v176_v62 = vcombine.low %v169_v45, %v170_v51  ;;  %v183_v63 = vrot.slane %v175_v52, %v1336_v10  ;;  %v285_v1 = vcombine.low %v277_v35, %v278_v46  ;;  %v286_v2 = vcombine.low %v279_v53, %v280_v54  ;;  %v1453_v54 = vld [vmem:[#allocation4 + $0x15] ss:$8 sm:$0x3] }
  0x33   :  { %v133_v6 = vrot.slane %v119_v57, %v1336_v10  ;;  %v245_v7 = vrot.slane %v231_v59, %v1336_v10  ;;  %v333_v8 = vmul.f32 %v1423_v55, %v1365_v26  ;;  %v334_v9 = vmul.f32 %v1425_v56, %v1369_v27  ;;  %v1455_v57 = vld [vmem:[#allocation4 + $0x25] ss:$8 sm:$0x3] }
  0x34   :  { %v190_v11 = vrot.slane %v176_v62, %v1336_v10  ;;  %v293_v13 = vrot.slane %v285_v1, %v1336_v10  ;;  %v300_v18 = vrot.slane %v286_v2, %v1336_v10  ;;  %v335_v28 = vmul.f32 %v1429_v61, %v1393_v37  ;;  %v1463_v1 = vld [vmem:[#allocation4 + $0x6] ss:$8 sm:$0x3] }
  0x35   :  { %v134_v29 = vcombine.low %v126_v58, %v133_v6  ;;  %v135_v34 = vcombine.high %v126_v58, %v133_v6  ;;  %v246_v35 = vcombine.low %v238_v60, %v245_v7  ;;  %v247_v38 = vcombine.high %v238_v60, %v245_v7  ;;  %v1457_v58 = vld [vmem:[#allocation4 + $0x35] ss:$8 sm:$0x3] }
  0x36   :  { %v191_v39 = vcombine.low %v183_v63, %v190_v11  ;;  %v192_v40 = vcombine.high %v183_v63, %v190_v11  ;;  %v301_v43 = vcombine.low %v293_v13, %v300_v18  ;;  %v302_v44 = vcombine.high %v293_v13, %v300_v18  ;;  %v1467_v13 = vld [vmem:[#allocation4 + $0x16] ss:$8 sm:$0x3] }
  0x37   :  { %v142_v45 = vrot.slane %v134_v29, %v1336_v10  ;;  %v149_v46 = vrot.slane %v135_v34, %v1336_v10  ;;  %v254_v47 = vrot.slane %v246_v35, %v1336_v10  ;;  %v261_v48 = vrot.slane %v247_v38, %v1336_v10  ;;  %v1472_v38 = vld [vmem:[#allocation4 + $0x26] ss:$8 sm:$0x3] }
  0x38   :  { %v199_v50 = vrot.slane %v191_v39, %v1336_v10  ;;  %v206_v51 = vrot.slane %v192_v40, %v1336_v10  ;;  %v309_v52 = vrot.slane %v301_v43, %v1336_v10  ;;  %v316_v53 = vrot.slane %v302_v44, %v1336_v10  ;;  %v1476_v44 = vld [vmem:[#allocation4 + $0x36] ss:$8 sm:$0x3] }
  0x39   :  { %v153_v59 = vsel %vm152_vm0, %v142_v45, 0.0  ;;  %v155_v60 = vsel %vm154_vm1, %v149_v46, 0.0  ;;  %v264_v62 = vsel %vm152_vm0, %v254_v47, 0.0  ;;  %v265_v63 = vsel %vm154_vm1, %v261_v48, 0.0 }
  0x3a   :  { %v156_v2 = vadd.f32 %v155_v60, %v153_v59  ;;  %v266_v6 = vadd.f32 %v265_v63, %v264_v62  ;;  %v209_v7 = vsel %vm152_vm0, %v199_v50, 0.0  ;;  %v210_v11 = vsel %vm154_vm1, %v206_v51, 0.0  ;;  %v1478_v45 = vld [vmem:[#allocation4 + $0x7] ss:$8 sm:$0x3] }
  0x3b   :  { %v211_v18 = vadd.f32 %v210_v11, %v209_v7  ;;  %v319_v29 = vsel %vm152_vm0, %v309_v52, 0.0  ;;  %v320_v34 = vsel %vm154_vm1, %v316_v53, 0.0  ;;  %v340_v35 = vcombine.low %v1389_v36, %v333_v8  ;;  %v1494_v51 = vld [vmem:[#allocation4 + $0x17] ss:$8 sm:$0x3] }
  0x3c   :  { %157 = vadd.xlane.f32.xlu0 %v156_v2  ;;  %267 = vadd.xlane.f32.xlu1 %v266_v6  ;;  %v321_v39 = vadd.f32 %v320_v34, %v319_v29  ;;  %v341_v40 = vcombine.low %v334_v9, %v335_v28  ;;  %v387_v43 = vmul.f32 %v1447_v49, %v1350_v19  ;;  %v1498_v60 = vld [vmem:[#allocation4 + $0x27] ss:$8 sm:$0x3]  ;;  %v1502_v7 = vld [vmem:[#allocation4 + $0x37] ss:$8 sm:$0x3] }
  0x3d   :  { %v348_v46 = vrot.slane %v340_v35, %v1336_v10  ;;  %v388_v47 = vmul.f32 %v1453_v54, %v1365_v26  ;;  %v389_v36 = vmul.f32 %v1455_v57, %v1369_v27  ;;  %v390_v8 = vmul.f32 %v1457_v58, %v1393_v37 }
  0x3e   :  { %v355_v9 = vrot.slane %v341_v40, %v1336_v10  ;;  %v442_v28 = vmul.f32 %v1463_v1, %v1350_v19  ;;  %v443_v48 = vmul.f32 %v1467_v13, %v1365_v26  ;;  %v444_v50 = vmul.f32 %v1472_v38, %v1369_v27 }
  0x3f   :  { %v395_v52 = vcombine.low %v387_v43, %v388_v47  ;;  %v396_v53 = vcombine.low %v389_v36, %v390_v8  ;;  %v445_v59 = vmul.f32 %v1476_v44, %v1393_v37  ;;  %v497_v62 = vmul.f32 %v1478_v45, %v1350_v19 }
  0x40   :  { %212 = vadd.xlane.f32.xlu0 %v211_v18  ;;  %322 = vadd.xlane.f32.xlu1 %v321_v39  ;;  %v356_v63 = vcombine.low %v348_v46, %v355_v9  ;;  %v357_v2 = vcombine.high %v348_v46, %v355_v9  ;;  %v450_v6 = vcombine.low %v442_v28, %v443_v48  ;;  %vm1021_vm10 = vcmask 523264  }
  0x41   :  { %v403_v11 = vrot.slane %v395_v52, %v1336_v10  ;;  %v410_v29 = vrot.slane %v396_v53, %v1336_v10  ;;  %v451_v34 = vcombine.low %v444_v50, %v445_v59  ;;  %v498_v35 = vmul.f32 %v1494_v51, %v1365_v26 }
  0x42   :  { %v364_v40 = vrot.slane %v356_v63, %v1336_v10  ;;  %v371_v43 = vrot.slane %v357_v2, %v1336_v10  ;;  %v458_v19 = vrot.slane %v450_v6, %v1336_v10  ;;  %v499_v18 = vmul.f32 %v1498_v60, %v1369_v27 }
  0x43   :  { %v411_v39 = vcombine.low %v403_v11, %v410_v29  ;;  %v412_v46 = vcombine.high %v403_v11, %v410_v29  ;;  %v465_v47 = vrot.slane %v451_v34, %v1336_v10  ;;  %v500_v36 = vmul.f32 %v1502_v7, %v1393_v37 }
  0x44   :  { %v374_v8 = vsel %vm152_vm0, %v364_v40, 0.0  ;;  %v375_v26 = vsel %vm154_vm1, %v371_v43, 0.0  ;;  %v505_v9 = vcombine.low %v497_v62, %v498_v35  ;;  %vm1124_vm11 = vcmask 24576  }
  0x45   :  { %v376_v28 = vadd.f32 %v375_v26, %v374_v8  ;;  %v419_v48 = vrot.slane %v411_v39, %v1336_v10  ;;  %v426_v50 = vrot.slane %v412_v46, %v1336_v10  ;;  %v466_v52 = vcombine.low %v458_v19, %v465_v47 }
  0x46   :  { %v467_v53 = vcombine.high %v458_v19, %v465_v47  ;;  %v506_v27 = vcombine.low %v499_v18, %v500_v36  ;;  %v513_v59 = vrot.slane %v505_v9, %v1336_v10 }
  0x47   :  { %377 = vadd.xlane.f32.xlu0 %v376_v28  ;;  %v429_v63 = vsel %vm152_vm0, %v419_v48, 0.0  ;;  %v430_v37 = vsel %vm154_vm1, %v426_v50, 0.0  ;;  %v474_v2 = vrot.slane %v466_v52, %v1336_v10 }
  0x48   :  { %v431_v6 = vadd.f32 %v430_v37, %v429_v63  ;;  %v481_v62 = vrot.slane %v467_v53, %v1336_v10  ;;  %v520_v11 = vrot.slane %v506_v27, %v1336_v10 }
  0x49   :  { %v484_v29 = vsel %vm152_vm0, %v474_v2, 0.0  ;;  %v558_v2 = vstv %s1654_s2 }
  0x4a   :  { %432 = vadd.xlane.f32.xlu1 %v431_v6  ;;  %v485_v34 = vsel %vm154_vm1, %v481_v62, 0.0  ;;  %v521_v35 = vcombine.low %v513_v59, %v520_v11  ;;  %v522_v40 = vcombine.high %v513_v59, %v520_v11 }
  0x4b   :  { %v486_v43 = vadd.f32 %v485_v34, %v484_v29 }
  0x4c   :  { %v529_v19 = vrot.slane %v521_v35, %v1336_v10  ;;  %v536_v18 = vrot.slane %v522_v40, %v1336_v10 }
  0x4d   :  { %487 = vadd.xlane.f32.xlu0 %v486_v43 }
  0x4e   :  { %v539_v39 = vsel %vm152_vm0, %v529_v19, 0.0  ;;  %v540_v46 = vsel %vm154_vm1, %v536_v18, 0.0  ;;  %v1255_v18 = vmov 1  }
  0x4f   :  { %v541_v47 = vadd.f32 %v540_v46, %v539_v39  ;;  %1164 = vset.pattern.permute.xlu1 %v1255_v18  ;;  %v1256_v39 = vmov 0   ;;  %v903_v18 = vcombine.low %v1478_v45, %v1494_v51 }
  0x50   :  { %1163 = vset.pattern.permute.xlu0 %v1256_v39  ;;  %v904_v39 = vcombine.low %v1498_v60, %v1502_v7 }
  0x51   :  { %542 = vadd.xlane.f32.xlu1 %v541_v47  ;;  %v911_v60 = vrot.slane %v903_v18, %v1336_v10 }
  0x52   :  { %v918_v7 = vrot.slane %v904_v39, %v1336_v10 }
  0xc5   :  { %v158_v36 = vpop.xlane.xlu0 %157  ;;  %v268_v8 = vpop.xlane.xlu1 %267 }
  0xc9   :  { %v213_v26 = vpop.xlane.xlu0 %212  ;;  %v323_v28 = vpop.xlane.xlu1 %322 }
  0xca   :  { %v545_v9 = vsel %vm544_vm2, %v158_v36, %v213_v26  ;;  %v1258_v26 = vmov 7  }
  0xcb   :  { %v547_v48 = vsel %vm546_vm3, %v545_v9, %v268_v8  ;;  %v1257_v8 = vmov 2   ;;  %v1259_v9 = vmov 3  }
  0xcc   :  { %v549_v52 = vsel %vm548_vm4, %v547_v48, %v323_v28  ;;  %v1260_v28 = vmov 4   ;;  %v1261_v48 = vmov 5  }
  0xd0   :  { %v378_v50 = vpop.xlane.xlu0 %377 }
  0xd1   :  { %v551_v53 = vsel %vm550_vm5, %v549_v52, %v378_v50  ;;  %v1262_v50 = vmov 6  }
  0xd3   :  { %v433_v27 = vpop.xlane.xlu1 %432 }
  0xd4   :  { %v553_v63 = vsel %vm552_vm6, %v551_v53, %v433_v27  ;;  %v627_v53 = vcombine.low %v1354_v21, %v1360_v24  ;;  %v628_v27 = vcombine.low %v1375_v30, %v1381_v33  ;;  %v720_v21 = vcombine.low %v1401_v41, %v1403_v42 }
  0xd5   :  { %v812_v33 = vcombine.low %v1455_v57, %v1457_v58 }
  0xd6   :  { %v488_v59 = vpop.xlane.xlu0 %487  ;;  %v635_v24 = vrot.slane %v627_v53, %v1336_v10  ;;  %v642_v30 = vrot.slane %v628_v27, %v1336_v10 }
  0xd7   :  { %v555_v37 = vsel %vm554_vm7, %v553_v63, %v488_v59  ;;  %v581_v59 = vcombine.low %v1338_v12, %v1341_v14  ;;  %v582_v63 = vcombine.low %v1343_v15, %v1358_v23  ;;  %v826_v58 = vrot.slane %v812_v33, %v1336_v10 }
  0xd8   :  { %v643_v41 = vcombine.low %v635_v24, %v642_v30  ;;  %v644_v42 = vcombine.high %v635_v24, %v642_v30 }
  0xd9   :  { %v589_v12 = vrot.slane %v581_v59, %v1336_v10  ;;  %v596_v14 = vrot.slane %v582_v63, %v1336_v10 }
  0xda   :  { %v543_v6 = vpop.xlane.xlu1 %542 }
  0xdb   :  { %v557_v62 = vsel %vm556_vm8, %v555_v37, %v543_v6  ;;  %v673_v37 = vcombine.low %v1345_v16, %v1347_v17  ;;  %v719_v6 = vcombine.low %v1356_v22, %v1377_v31  ;;  %v766_v22 = vcombine.low %v1425_v56, %v1429_v61 }
  0xdc   :  { %v559_v11 = vadd.f32 %v558_v2, %v557_v62  ;;  %v674_v2 = vcombine.low %v1352_v20, %v1379_v32  ;;  %v765_v20 = vcombine.low %v1362_v25, %v1423_v55  ;;  %v734_v31 = vrot.slane %v720_v21, %v1336_v10 }
  0xdd   :  { %v681_v16 = vrot.slane %v673_v37, %v1336_v10  ;;  %v727_v23 = vrot.slane %v719_v6, %v1336_v10  ;;  %v811_v32 = vcombine.low %v1447_v49, %v1453_v54  ;;  %v597_v62 = vcombine.low %v589_v12, %v596_v14 }
  0xde   :  { %v561_v29 = vsel %vm560_vm9, %v559_v11, -inf  ;;  %v688_v17 = vrot.slane %v674_v2, %v1336_v10  ;;  %v857_v25 = vcombine.low %v1463_v1, %v1467_v13  ;;  %v858_v55 = vcombine.low %v1472_v38, %v1476_v44 }
  0xdf   :  { %562 = vmax.xlane.f32.xlu0 %v561_v29  ;;  %v780_v49 = vrot.slane %v766_v22, %v1336_v10  ;;  %v735_v54 = vcombine.low %v727_v23, %v734_v31  ;;  %v819_v57 = vrot.slane %v811_v32, %v1336_v10  ;;  %v605_v1 = vrot.slane %v597_v62, %v1336_v10 }
  0xe0   :  { %v689_v56 = vcombine.low %v681_v16, %v688_v17  ;;  %v690_v61 = vcombine.high %v681_v16, %v688_v17  ;;  %v865_v44 = vrot.slane %v857_v25, %v1336_v10 }
 0x168   :  { %v563_v34 = vpop.xlane.xlu0 %562 }
 0x169   :  { %v564_v35 = vsub.f32 %v559_v11, %v563_v34  ;;  %v598_v11 = vcombine.high %v589_v12, %v596_v14  ;;  %v773_v34 = vrot.slane %v765_v20, %v1336_v10 }
 0x16b   :  { %v565_v40 = vmul.f32 1.442695, %v564_v35  ;;  %v736_v35 = vcombine.high %v727_v23, %v734_v31  ;;  %v612_v13 = vrot.slane %v598_v11, %v1336_v10  ;;  %v919_v23 = vcombine.low %v911_v60, %v918_v7 }
 0x16c   :  { %v920_v31 = vcombine.high %v911_v60, %v918_v7 }
 0x16d   :  { %1172 = vpow2.f32 %v565_v40  ;;  %v651_v40 = vrot.slane %v643_v41, %v1336_v10 }
 0x17a   :  { %v1173_v43 = vpop.eup %1172 }
 0x17b   :  { %v567_v19 = vsel %vm560_vm9, %v1173_v43, 0.0 }
 0x17c   :  { %568 = vadd.xlane.f32.xlu1 %v567_v19  ;;  %v872_v19 = vrot.slane %v858_v55, %v1336_v10 }
 0x17e   :  { %v873_v51 = vcombine.low %v865_v44, %v872_v19  ;;  %v874_v63 = vcombine.high %v865_v44, %v872_v19 }
 0x180   :  { %v881_v20 = vrot.slane %v873_v51, %v1336_v10  ;;  %v888_v22 = vrot.slane %v874_v63, %v1336_v10 }
 0x205   :  { %v569_v46 = vpop.xlane.xlu1 %568 }
 0x206   :  { %1174 = vrcp.f32 %v569_v46  ;;  %v697_v46 = vrot.slane %v689_v56, %v1336_v10  ;;  %v927_v56 = vrot.slane %v919_v23, %v1336_v10  ;;  %v1008_v23 = vld [vmem:[#allocation7 + $0x90] sm:$0xff] }
 0x213   :  { %v1175_v47 = vpop.eup %1174 }
 0x214   :  { %v571_v36 = vmul.f32 %v1175_v47, %v1173_v43  ;;  %v658_v43 = vrot.slane %v644_v42, %v1336_v10  ;;  %v704_v47 = vrot.slane %v690_v61, %v1336_v10  ;;  %v934_v61 = vrot.slane %v920_v31, %v1336_v10  ;;  %v1007_v31 = vld [vmem:[#allocation7 + $0x88] sm:$0xff] }
 0x216   :  { %620 = vperm.xlu1 %1164, %v571_v36   ;;  %574 = vperm.xlu0 %1163, %v571_v36  }
 0x21a   :  { %1165 = vset.pattern.permute.xlu1 %v1257_v8  ;;  %1171 = vset.pattern.permute.xlu0 %v1258_v26  ;;  %v782_v8 = vcombine.high %v773_v34, %v780_v49 }
 0x21b   :  { %666 = vperm.xlu1 %1165, %v571_v36  }
 0x21c   :  { %v796_v21 = vrot.slane %v782_v8, %v1336_v10  ;;  %v1002_v8 = vld [vmem:[#allocation7 + $0x60] sm:$0xff] }
 0x21f   :  { %1166 = vset.pattern.permute.xlu1 %v1259_v9  ;;  %v743_v9 = vrot.slane %v735_v54, %v1336_v10 }
 0x220   :  { %712 = vperm.xlu1 %1166, %v571_v36  }
 0x224   :  { %1167 = vset.pattern.permute.xlu1 %v1260_v28  ;;  %v750_v28 = vrot.slane %v736_v35, %v1336_v10 }
 0x225   :  { %758 = vperm.xlu1 %1167, %v571_v36  }
 0x229   :  { %1168 = vset.pattern.permute.xlu1 %v1261_v48  ;;  %v827_v48 = vcombine.low %v819_v57, %v826_v58 }
 0x22a   :  { %804 = vperm.xlu1 %1168, %v571_v36  }
 0x22b   :  { %v835_v24 = vrot.slane %v827_v48, %v1336_v10  ;;  %v998_v48 = vld [vmem:[#allocation7 + $0x40] sm:$0xff] }
 0x22e   :  { %1169 = vset.pattern.permute.xlu1 %v1262_v50  ;;  %v828_v50 = vcombine.high %v819_v57, %v826_v58 }
 0x22f   :  { %850 = vperm.xlu1 %1169, %v571_v36  }
 0x230   :  { %v842_v30 = vrot.slane %v828_v50, %v1336_v10  ;;  %v997_v50 = vld [vmem:[#allocation7 + $0x38] sm:$0xff] }
 0x233   :  { %1170 = vset.pattern.permute.xlu1 %v1258_v26 }
 0x234   :  { %896 = vperm.xlu1 %1170, %v571_v36   ;;  %v781_v36 = vcombine.low %v773_v34, %v780_v49 }
 0x236   :  { %v789_v6 = vrot.slane %v781_v36, %v1336_v10  ;;  %v1005_v10 = vld [vmem:[#allocation7 + $0x78] sm:$0xff]  ;;  %v1003_v36 = vld [vmem:[#allocation7 + $0x68] sm:$0xff] }
 0x291   :  { %v621_v52 = vpop.permute.xlu1 %620  ;;  %v575_v38 = vpop.permute.xlu0 %574 }
 0x292   :  { %v661_v53 = vmul.f32 %v651_v40, %v621_v52  ;;  %v662_v27 = vmul.f32 %v658_v43, %v621_v52  ;;  %v615_v59 = vmul.f32 %v605_v1, %v575_v38  ;;  %v616_v45 = vmul.f32 %v612_v13, %v575_v38 }
 0x294   :  { %v663_v52 = vadd.f32 %v661_v53, %v615_v59  ;;  %v664_v14 = vadd.f32 %v662_v27, %v616_v45  ;;  %v996_v53 = vld [vmem:[#allocation7 + $0x30] sm:$0xff]  ;;  %v995_v27 = vld [vmem:[#allocation7 + $0x28] sm:$0xff] }
 0x296   :  { %v667_v15 = vpop.permute.xlu1 %666 }
 0x297   :  { %v707_v37 = vmul.f32 %v697_v46, %v667_v15  ;;  %v708_v2 = vmul.f32 %v704_v47, %v667_v15  ;;  %v1263_v46 = vmov 0.0   ;;  %v1004_v47 = vld [vmem:[#allocation7 + $0x70] sm:$0xff] }
 0x298   :  { %1025 = vmatprep.subr.mxu0 %v1263_v46 }
 0x299   :  { %v709_v15 = vadd.f32 %v707_v37, %v663_v52  ;;  %v710_v32 = vadd.f32 %v708_v2, %v664_v14  ;;  %1026 = vmatpush1.msra.mxu0 %v1005_v10  ;;  %v990_v52 = vld [vmem:[#allocation7] sm:$0xff]  ;;  %v1013_v14 = vld [vmem:[#allocation7 + $0xb8] sm:$0xff] }
 0x29a   :  { %1027 = vmatprep.subr.mxu0 %v1263_v46 }
 0x29b   :  { %v713_v29 = vpop.permute.xlu1 %712  ;;  %1028 = vmatpush1.msra.mxu0 %v1004_v47  ;;  %v1118_v47 = vand.u32 127, %v73_v0 }
 0x29c   :  { %v753_v16 = vmul.f32 %v743_v9, %v713_v29  ;;  %v754_v17 = vmul.f32 %v750_v28, %v713_v29  ;;  %1029 = vmatprep.subr.mxu0 %v1263_v46  ;;  %v1000_v9 = vld [vmem:[#allocation7 + $0x50] sm:$0xff]  ;;  %v999_v28 = vld [vmem:[#allocation7 + $0x48] sm:$0xff] }
 0x29d   :  { %1030 = vmatpush1.msra.mxu0 %v1003_v36  ;;  %v1121_v36 = vsub.s32 %v1118_v47, %v1322_v3 }
 0x29e   :  { %v755_v42 = vadd.f32 %v753_v16, %v709_v15  ;;  %v756_v62 = vadd.f32 %v754_v17, %v710_v32  ;;  %1031 = vmatprep.subr.mxu0 %v1263_v46  ;;  %v1012_v16 = vld [vmem:[#allocation7 + $0xb0] sm:$0xff]  ;;  %v1011_v17 = vld [vmem:[#allocation7 + $0xa8] sm:$0xff]  ;;  %v1006_v15 = vld [vmem:[#allocation7 + $0x80] sm:$0xff] }
 0x29f   :  { %1032 = vmatpush1.msra.mxu0 %v1002_v8 }
 0x2a0   :  { %v759_v26 = vpop.permute.xlu1 %758  ;;  %1033 = vmatprep.subr.mxu0 %v1263_v46 }
 0x2a1   :  { %v799_v33 = vmul.f32 %v789_v6, %v759_v26  ;;  %v800_v41 = vmul.f32 %v796_v21, %v759_v26  ;;  %v1001_v26 = vld [vmem:[#allocation7 + $0x58] sm:$0xff]  ;;  %v994_v21 = vld [vmem:[#allocation7 + $0x20] sm:$0xff] }
 0x2a2   :  { %1034 = vmatpush1.msra.mxu0 %v1001_v26 }
 0x2a3   :  { %v801_v29 = vadd.f32 %v799_v33, %v755_v42  ;;  %v802_v34 = vadd.f32 %v800_v41, %v756_v62  ;;  %1035 = vmatprep.subr.mxu0 %v1263_v46  ;;  %v962_v42 = vld [vmem:[%s1655_s3] sm:$0x3] }
 0x2a4   :  { %1036 = vmatpush1.msra.mxu0 %v1000_v9  ;;  %v976_v62 = vld [vmem:[%s1656_s4] sm:$0x3] }
 0x2a5   :  { %v805_v12 = vpop.permute.xlu1 %804  ;;  %1037 = vmatprep.subr.mxu0 %v1263_v46 }
 0x2a6   :  { %v845_v11 = vmul.f32 %v835_v24, %v805_v12  ;;  %v846_v25 = vmul.f32 %v842_v30, %v805_v12  ;;  %1038 = vmatpush1.msra.mxu0 %v999_v28  ;;  %v993_v24 = vld [vmem:[#allocation7 + $0x18] sm:$0xff]  ;;  %v992_v30 = vld [vmem:[#allocation7 + $0x10] sm:$0xff]  ;;  %v991_v12 = vld [vmem:[#allocation7 + $0x8] sm:$0xff] }
 0x2a7   :  { %1039 = vmatprep.subr.mxu0 %v1263_v46 }
 0x2a8   :  { %v847_v35 = vadd.f32 %v845_v11, %v801_v29  ;;  %v848_v57 = vadd.f32 %v846_v25, %v802_v34  ;;  %1040 = vmatpush1.msra.mxu0 %v998_v48  ;;  %v967_v11 = vrot.slane %v962_v42, %v1325_v4  ;;  %v971_v25 = vrot.slane %v962_v42, %v1328_v5 }
 0x2a9   :  { %1041 = vmatprep.subr.mxu0 %v1263_v46  ;;  %v985_v29 = vrot.slane %v976_v62, %v1328_v5 }
 0x2aa   :  { %v851_v55 = vpop.permute.xlu1 %850  ;;  %1042 = vmatpush1.msra.mxu0 %v997_v50 }
 0x2ab   :  { %v891_v49 = vmul.f32 %v881_v20, %v851_v55  ;;  %v892_v54 = vmul.f32 %v888_v22, %v851_v55  ;;  %1043 = vmatprep.subr.mxu0 %v1263_v46  ;;  %v1010_v20 = vld [vmem:[#allocation7 + $0xa0] sm:$0xff]  ;;  %v1009_v22 = vld [vmem:[#allocation7 + $0x98] sm:$0xff] }
 0x2ac   :  { %1044 = vmatpush1.msra.mxu0 %v996_v53 }
 0x2ad   :  { %v893_v40 = vadd.f32 %v891_v49, %v847_v35  ;;  %v894_v43 = vadd.f32 %v892_v54, %v848_v57  ;;  %1045 = vmatprep.subr.mxu0 %v1263_v46 }
 0x2ae   :  { %1046 = vmatpush1.msra.mxu0 %v995_v27 }
 0x2af   :  { %v897_v58 = vpop.permute.xlu1 %896  ;;  %1047 = vmatprep.subr.mxu0 %v1263_v46 }
 0x2b0   :  { %v937_v1 = vmul.f32 %v927_v56, %v897_v58  ;;  %v938_v13 = vmul.f32 %v934_v61, %v897_v58  ;;  %1048 = vmatpush1.msra.mxu0 %v994_v21  ;;  %v981_v61 = vrot.slane %v976_v62, %v1325_v4  ;;  %v1142_v58 = vld [vmem:[%s1658_s6] ss:$0 sm:$0xff]  ;;  %s1264_s6 = smov [#allocation9]  }
 0x2b1   :  { %1049 = vmatprep.subr.mxu0 %v1263_v46  ;;  %v1144_v4 = vld [vmem:[%s1659_s7] ss:$0 sm:$0xff]  ;;  %s1132_s7 = sshll.u32 %s1264_s6, 4  ;;  %s1133_s7 = int_to_ptr.vmem [resolvable:$true] %s1132_s7 }
 0x2b2   :  { %v939_v38 = vadd.f32 %v937_v1, %v893_v40  ;;  %v940_v44 = vadd.f32 %v938_v13, %v894_v43  ;;  %1050 = vmatpush1.msra.mxu0 %v993_v24  ;;  %s1222_s10 = scalar_lea.vmem %s1133_s7, 16  ;;  %p1227_p11 = scmp.lt.s32.totalorder %s1133_s7, %s1133_s7 }
 0x2b3   :  { %1051 = vmatprep.subr.mxu0 %v1263_v46  ;;  %p1223_p10 = scmp.ne.s32.totalorder %s1133_s7, %s1222_s10 }
 0x2b4   :  { %v941_v19 = vsel %vm152_vm0, %v939_v38, 0.0  ;;  %v942_v18 = vsel %vm154_vm1, %v940_v44, 0.0  ;;  %1052 = vmatpush1.msra.mxu0 %v992_v30 }
 0x2b5   :  { %v943_v39 = vadd.f32 %v942_v18, %v941_v19  ;;  %1053 = vmatprep.subr.mxu0 %v1263_v46 }
 0x2b6   :  { %1054 = vmatpush1.msra.mxu0 %v991_v12 }
 0x2b7   :  { %944 = vadd.xlane.f32.xlu1 %v943_v39  ;;  %1055 = vmatprep.subr.mxu0 %v1263_v46 }
 0x2b8   :  { %1056 = vmatpush1.msra.mxu0 %v990_v52 }
 0x2b9   :  { %1073 = vmatprep.subr.mxu0 %v1263_v46 }
 0x2ba   :  { %1074 = vmatpush2.msra.mxu0 %v1013_v14 }
 0x2bb   :  { %1075 = vmatprep.subr.mxu0 %v1263_v46 }
 0x2bc   :  { %1076 = vmatpush2.msra.mxu0 %v1012_v16 }
 0x2bd   :  { %1077 = vmatprep.subr.mxu0 %v1263_v46 }
 0x2be   :  { %1078 = vmatpush2.msra.mxu0 %v1011_v17 }
 0x2bf   :  { %1079 = vmatprep.subr.mxu0 %v1263_v46 }
 0x2c0   :  { %1080 = vmatpush2.msra.mxu0 %v1010_v20 }
 0x2c1   :  { %1081 = vmatprep.subr.mxu0 %v1263_v46 }
 0x2c2   :  { %1082 = vmatpush2.msra.mxu0 %v1009_v22 }
 0x2c3   :  { %1083 = vmatprep.subr.mxu0 %v1263_v46 }
 0x2c4   :  { %1084 = vmatpush2.msra.mxu0 %v1008_v23 }
 0x2c5   :  { %1085 = vmatprep.subr.mxu0 %v1263_v46 }
 0x2c6   :  { %1086 = vmatpush2.msra.mxu0 %v1007_v31 }
 0x2c7   :  { %1087 = vmatprep.subr.mxu0 %v1263_v46 }
 0x2c8   :  { %1088 = vmatpush2.msra.mxu0 %v1006_v15 }
 0x340   :  { %v945_v59 = vpop.xlane.xlu1 %944 }
 0x341   :  { %v947_v45 = vmul.f32 0.0052083335, %v945_v59 }
 0x343   :  { %v948_v51 = vsub.f32 %v939_v38, %v947_v45  ;;  %v949_v63 = vsub.f32 %v940_v44, %v947_v45  ;;  %v1108_v44 = vstv %s1660_s8  ;;  %s1226_s8 = scalar_lea.vmem %s1133_s7, 32 }
 0x344   :  { %p1228_p12 = scmp.lt.s32.totalorder %s1226_s8, %s1222_s10 }
 0x345   :  { %v950_v60 = vmul.f32 %v948_v51, %v948_v51  ;;  %v951_v7 = vmul.f32 %v949_v63, %v949_v63 }
 0x346   :  { %p1229_p13 = por %p1228_p12, %p1227_p11 }
 0x347   :  { %v952_v37 = vsel %vm152_vm0, %v950_v60, 0.0  ;;  %v953_v2 = vsel %vm154_vm1, %v951_v7, 0.0 }
 0x348   :  { %v954_v6 = vadd.f32 %v953_v2, %v952_v37  ;;  %p1230_p0 = pnand %p1229_p13, %p1223_p10 }
 0x34a   :  { %955 = vadd.xlane.f32.xlu0 %v954_v6 }
 0x3d3   :  { %v956_v32 = vpop.xlane.xlu0 %955 }
 0x3d4   :  { %v957_v33 = vmul.f32 0.0052083335, %v956_v32 }
 0x3d6   :  { %v958_v41 = vadd.f32 1e-05, %v957_v33 }
 0x3d8   :  { %1176 = vrsqrt.f32 %v958_v41 }
 0x3e5   :  { %v1177_v55 = vpop.eup %1176 }
 0x3e6   :  { %v961_v56 = vmul.f32 %v1177_v55, %v949_v63  ;;  %v960_v34 = vmul.f32 %v1177_v55, %v948_v51 }
 0x3e8   :  { %v975_v49 = vmul.f32 %v971_v25, %v961_v56  ;;  %v974_v54 = vmul.f32 %v967_v11, %v960_v34 }
 0x3ea   :  { %v989_v35 = vadd.f32 %v985_v29, %v975_v49  ;;  %v988_v57 = vadd.f32 %v981_v61, %v974_v54 }
 0x3ec   :  { %1143 = vmatprep.mubr.msk.f32.mxu0 %vm1021_vm10, %v989_v35 }
 0x3ed   :  { %1090 = vmatmul.mubr.f32.vlgmr.msra.gmra.mxu0 %v988_v57 }
 0x4ad   :  { %v1091_v40 = vpop.f32.mrf.mxu0 }
 0x4ae   :  { %v1092_v43 = vadd.f32 %v1142_v58, %v1091_v40 }
 0x4af   :  { %v1093_v1 = vpop.f32.mrf.mxu0 }
 0x4b0   :  { %v1095_v5 = vmax.f32 %v1092_v43, 0.0 }
 0x4b2   :  { %v1103_v13 = vmul.f32 %v1144_v4, %v1095_v5 }
 0x4b4   :  { %v1104_v38 = vsel %vm152_vm0, %v1103_v13, 0.0 }
 0x4b5   :  { %1105 = vadd.xlane.f32.xlu0 %v1104_v38 }
 0x53e   :  { %v1106_v19 = vpop.xlane.xlu0 %1105 }
 0x53f   :  { %v1109_v18 = vadd.f32 %v1108_v44, %v1106_v19 }
 0x541   :  { %v1145_v39 = vmul.f32 -1.442695, %v1109_v18 }
 0x543   :  { %1178 = vpow2.f32 %v1145_v39 }
 0x550   :  { %v1179_v10 = vpop.eup %1178 }
 0x551   :  { %v1113_v46 = vadd.f32 1.0, %v1179_v10 }
 0x553   :  { %1180 = vrcp.f32 %v1113_v46 }
 0x560   :  { %v1181_v8 = vpop.eup %1180 }
 0x561   :  { %v1122_v26 = vrot.slane %v1181_v8, %v1121_v36 }
 0x563   :  { %1125 = vst.msk [vmem:[#allocation9] sm:$0x1] %vm1124_vm11, %v1122_v26 }
 0x564   :  { %1233 = shalt.err (!%p1230_p0)
}
 0x565   :  { %1135 = dma.vmem_to_hbm [thread:$0]  %s1133_s7, 16, %s1661_s9, [#allocation6]  }
 0x566   :  { %1246 = dma.done.wait [#allocation6], 16  }
 0x567   :  { %1247 = vsyncadd [#allocation6], 4294967280 }
 0x568   :  { %1139 = vsyncpa [#allocation5], 1 }
 0x569   :  { %1140 = vsyncpa [#allocation8], 1 }
 0x56a   :  { %1141 = vsyncpa [#allocation6], 1 }

</bundles_post_ra>
